<compile_context>
chip_gen: v7x
topology: tpu7x:2x2x1
jax: 0.10.0
libtpu: 0.0.40
codegen_flags: <defaults>
</compile_context>

<pallas_src>
import jax
import jax.numpy as jnp
from jax.experimental import pallas as pl
from jax.experimental.pallas import tpu as pltpu

_LANES = 128
_SUBLANES = 8
# Below this element count a fused XLA broadcast already hits the HBM-write
# roofline with zero launch/grid overhead; Pallas can at best tie.
_PALLAS_MIN_ELEMS = 1 << 20


def _default_tile_rows_max():
    """Rows per (rows, 128) f32 output block, per TPU generation.

    4 MiB blocks on v5e/v6e (2x-buffered = 8 MiB: inside v5e's 16 MiB scoped
    VMEM default, at v6e's mem-bound efficiency plateau); 8 MiB on v7x
    (16 MiB double-buffered, inside its 32 MiB scoped default) to amortize the
    ~0.35 us per-grid-step overhead against the faster HBM.
    """
    try:
        kind = jax.devices()[0].device_kind.lower()
    except Exception:
        kind = ""
    if "v7" in kind:
        return 16384      # 8 MiB per block
    return 8192           # 4 MiB per block


def _fill_kernel(bias_ref, out_ref):
    # bias_ref: (1,) f32 parameter in SMEM
    # out_ref:  (tile_rows, 128) f32 block in VMEM
    val = 1.0 + bias_ref[0]                                      # scalar unit
    out_ref[...] = jnp.full(out_ref.shape, val, out_ref.dtype)   # splat + dense vst


def trivial_model_forward(batch, bias, *, example_length, encoder_length,
                          output_dim, force_pallas=False, tile_rows_max=None):
    """Pallas implementation of TrivialModel.forward.

    batch: dict[str, jnp.ndarray or None]; only used to derive bs (like PyTorch).
    bias:  jnp.ndarray of shape (1,), float32 (the nn.Parameter).
    """
    predict_steps = example_length - encoder_length
    bs = max((t.shape[0] if t is not None else 0) for t in batch.values())
    n = bs * predict_steps * output_dim
    out_shape = (bs, predict_steps, output_dim)
    bias = bias.astype(jnp.float32)

    # Pallas is only worthwhile when it can be copy-free (n lane-aligned) and
    # large enough to amortize launch overhead; everything else goes to the
    # fused XLA broadcast, which is already at the HBM-write roofline.
    lane_aligned = (n > 0) and (n % _LANES == 0)
    use_pallas = lane_aligned and (force_pallas or n >= _PALLAS_MIN_ELEMS)

    if not use_pallas:
        return jnp.full(out_shape, 1.0, jnp.float32) + bias

    # Lane-dense, copy-free layout: exactly (rows, 128) f32 with rows*128 == n,
    # so the final reshape is pure metadata (no slice, no extra HBM pass).
    rows = n // _LANES
    max_rows = tile_rows_max if tile_rows_max is not None else _default_tile_rows_max()
    if rows <= max_rows:
        tile_rows = rows                                   # single block == full array
    else:
        tile_rows = (max_rows // _SUBLANES) * _SUBLANES    # (8,128)-legal tile;
                                                           # partial last block is masked
    grid = (pl.cdiv(rows, tile_rows),)

    flat = pl.pallas_call(
        _fill_kernel,
        out_shape=jax.ShapeDtypeStruct((rows, _LANES), jnp.float32),
        grid=grid,
        in_specs=[
            pl.BlockSpec(memory_space=pltpu.SMEM),   # bias scalar parameter
        ],
        out_specs=pl.BlockSpec((tile_rows, _LANES), lambda i: (i, 0)),
        compiler_params=pltpu.CompilerParams(
            dimension_semantics=("parallel",),       # shards rows across v7x's 2 TCs
        ),
    )(bias)

    # Exact-size reshape (rows*128 == n): free, restores (batch, time, quantile).
    return flat.reshape(out_shape)


if __name__ == "__main__":
    key = jax.random.PRNGKey(0)
    k1, k2, k3, k4 = jax.random.split(key, 4)

    # Deterministic parameter init: nn.Parameter(torch.ones(1))
    bias = jnp.ones((1,), dtype=jnp.float32)

    # --- Config A: lane-aligned config; forces the Pallas path and (via a
    #     small tile override) exercises a multi-block grid with a masked
    #     partial last block.  n = 192*4*2 = 1536 = 12 * 128 lanes. ---
    example_length, encoder_length, output_dim = 10, 6, 2
    predict_steps = example_length - encoder_length      # 4
    bs = 192
    batch = {
        "target": jax.random.normal(k1, (bs, example_length, output_dim), jnp.float32),
        "target_masked": jax.random.normal(k2, (bs, example_length, output_dim), jnp.float32),
        "weight": None,
    }
    expected = jnp.full((bs, predict_steps, output_dim), 1.0, jnp.float32) + bias

    out = trivial_model_forward(
        batch, bias,
        example_length=example_length,
        encoder_length=encoder_length,
        output_dim=output_dim,
        force_pallas=True,
        tile_rows_max=8,          # rows=12 -> grid=(2,), last block masked
    )
    out = jax.block_until_ready(out)
    assert out.shape == (bs, predict_steps, output_dim), out.shape
    assert out.dtype == jnp.float32, out.dtype
    assert jnp.allclose(out, expected), (out, expected)

    # --- Config B: the module's tiny default-ish config (quantiles=[.1,.5,.9]);
    #     not lane-aligned / tiny, so it takes the fused-XLA roofline path. ---
    example_length_b, encoder_length_b, output_dim_b = 8, 6, 3
    ps_b = example_length_b - encoder_length_b            # 2
    bs_b = 2
    batch_b = {
        "target": jax.random.normal(k3, (bs_b, example_length_b, output_dim_b), jnp.float32),
        "target_masked": jax.random.normal(k4, (bs_b, example_length_b, output_dim_b), jnp.float32),
        "weight": None,
    }
    expected_b = jnp.full((bs_b, ps_b, output_dim_b), 1.0, jnp.float32) + bias
    out_b = trivial_model_forward(
        batch_b, bias,
        example_length=example_length_b,
        encoder_length=encoder_length_b,
        output_dim=output_dim_b,
    )
    out_b = jax.block_until_ready(out_b)
    assert out_b.shape == (bs_b, ps_b, output_dim_b), out_b.shape
    assert jnp.allclose(out_b, expected_b), (out_b, expected_b)

    print("KERNEL_OK")
</pallas_src>

<mosaic_0001>
module attributes {stable_mosaic.version = 11 : i64} {
  func.func @_fill_kernel(%arg0: i32, %arg1: memref<1xf32, #tpu.memory_space<smem>>, %arg2: memref<8x128xf32, #tpu.memory_space<vmem>>) attributes {dimension_semantics = [#tpu.dimension_semantics<parallel>], iteration_bounds = array<i64: 2>, scalar_prefetch = 0 : i64, scratch_operands = 0 : i64, tpu.core_type = #tpu.core_type<tc>, window_params = [{transform_indices = @transform_0, window_bounds = array<i64: 1>}, {transform_indices = @transform_1, window_bounds = array<i64: 8, 128>}]} {
    %c0 = arith.constant 0 : index
    %0 = memref.load %arg1[%c0] : memref<1xf32, #tpu.memory_space<smem>>
    %cst = arith.constant 1.000000e+00 : f32
    %1 = arith.addf %cst, %0 : f32
    %2 = vector.broadcast %1 : f32 to vector<8x128xf32>
    %c0_0 = arith.constant 0 : index
    %c0_1 = arith.constant 0 : index
    %3 = vector.load %arg2[%c0_0, %c0_1] : memref<8x128xf32, #tpu.memory_space<vmem>>, vector<8x128xf32>
    tpu.vector_store %arg2[%c0_0, %c0_1], %2 {strides = array<i32>} : memref<8x128xf32, #tpu.memory_space<vmem>>, vector<8x128xf32>,
    return
  }
  func.func @transform_0(%arg0: i32) -> i32 {
    %c0_i32 = arith.constant 0 : i32
    %c0_i32_0 = arith.constant 0 : i32
    return %c0_i32 : i32
  }
  func.func @transform_1(%arg0: i32) -> (i32, i32) {
    %c0_i32 = arith.constant 0 : i32
    %c0_i32_0 = arith.constant 0 : i32
    return %arg0, %c0_i32 : i32, i32
  }
}

</mosaic_0001>

<bundles_post_ra>
// kernel: tpu_custom_call.1
= control target key start
LH: loop header
LB: loop body
LE: loop exit
PB: predicated region body
PF: predicated region fallthrough
CT: control target
= control target key end

     0   :  { %s377_s0 = inlined_call_operand.<no memory space> [shape: f32[1], index: 0, kind: input, shape index: {}]   ;;  %s378_s1 = inlined_call_operand.hbm [shape: f32[12,128], index: 1, kind: output, shape index: {}]  }
   0x1   :  { %6 = sst [smem:[#allocation2]] %s377_s0 }
   0x2   :  { %7 = vsyncpa [#allocation4], 0 }
   0x3   :  { %9 = vsyncpa [#allocation4 + $0x1], 0  ;;  %s286_s8 = smov 0   ;;  %s288_s9 = smov 0  }
   0x4   :  { %s290_s10 = smov 0   ;;  %s292_s11 = smov 0  }
   0x5 LB: > { %s160_s0 = sadd.s32 4294967295, %s270_s11   ;;  %s161_s12 = sadd.s32 4294967294, %s270_s11   ;;  %s270_s11 = sphi %s292_s11, %s384_s11   ;;  %s266_s10 = sphi %s290_s10, %s383_s10   ;;  %s262_s9 = sphi %s288_s9, %s382_s9   ;;  %s258_s8 = sphi %s286_s8, %s381_s8  }
   0x6   : > { %s309_s13 = sadd.s32 1, %s270_s11   ;;  %s43_s14 = sadd.s32 1, %s266_s10 }
   0x7   : > { %s40_s15 = ssub.s32 %s270_s11, %s309_s13  ;;  %p53_p0 = scmp.ne.s32.totalorder %s266_s10, %s262_s9 }
   0x8   : > { %p41_p1 = scmp.eq.s32.totalorder %s40_s15, 0  ;;  %p54_p2 = scmp.eq.s32.totalorder %s160_s0, 1 }
   0x9   : > { %p59_p3 = scmp.ne.s32.totalorder %s262_s9, %s258_s8  ;;  %p60_p4 = scmp.eq.s32.totalorder %s161_s12, 1 }
   0xa   : > { %s319_s16 = scalar_select %p41_p1, %s266_s10, %s43_s14  }
   0xb   : > { %p321_p5 = por %p54_p2, %p53_p0  ;;  %p325_p6 = por %p60_p4, %p59_p3 }
   0xc   : > { %p163_p7 = scmp.ge.s32.totalorder %s270_s11, 1  ;;  %p81_p8 = scmp.lt.s32.totalorder %s270_s11, 3 }
   0xe   : > { %p82_p9 = pnand %p163_p7, %p81_p8 }
   0xf   : > { %s93_s19 = sand.u32 (!%p82_p9), 1, %s262_s9   ;;  %s96_s20 = sld [smem:[#allocation2]] (!%p82_p9) }
  0x10   : > { %85 = sbr.rel (%p82_p9) target bundleno = 42 (0x2a), region = 24  ;;  %s164_s21 = sshll.u32 (!%p82_p9), %s93_s19, 3 }
  0x11   : > { %s95_s22 = scalar_lea.vmem (!%p82_p9), [#allocation3], %s164_s21  ;;  %s166_s24 = sshll.u32 (!%p82_p9), %s160_s0, 7 }
  0x12   : > { %s114_s23 = sshll.u32 (!%p82_p9), %s95_s22, 4  ;;  %s337_s28 = scalar_lea.hbm (!%p82_p9), %s378_s1, %s166_s24  ;;  %s332_s23 = int_to_ptr.vmem [resolvable:$true] %s114_s23 }
  0x13   : > { %s101_s29 = scalar_lea.sflag (!%p82_p9), [#allocation4], %s93_s19  ;;  %s208_s30 = scalar_lea.vmem (!%p82_p9), %s332_s23, 128 }
  0x14   : > { %p209_p10 = scmp.ne.s32.totalorder (!%p82_p9), %s332_s23, %s208_s30  ;;  %s272_s2 = smov (!%p82_p9), [#allocation3]  }
  0x15   : > { %s97_s25 = sadd.f32 (!%p82_p9), 1.0, %s96_s20  ;;  %s212_s3 = sshll.u32 (!%p82_p9), %s272_s2, 4  ;;  %s213_s3 = int_to_ptr.vmem [resolvable:$false] %s212_s3 }
  0x16   : > { %p210_p11 = pnand (!%p82_p9), %p209_p10, %p321_p5  ;;  %s214_s4 = scalar_lea.vmem (!%p82_p9), %s213_s3, 256 }
  0x17   : > { %v98_v0 = vstv %s97_s25  ;;  %p215_p13 = scmp.lt.s32.totalorder %s332_s23, %s213_s3  ;;  %p216_p0 = scmp.lt.s32.totalorder %s214_s4, %s208_s30 }
  0x18   : > { %99 = vst [vmem:[%s95_s22] sm:$0xff] %v98_v0  ;;  %p211_p12 = pneg %p210_p11 }
  0x19   : > { %p217_p1 = por %p216_p0, %p215_p13 }
  0x1b   : > { %p218_p2 = pnand %p217_p1, %p211_p12 }
  0x1d   : > { %221 = shalt.err (!%p218_p2)
}
  0x1e   : > { %s222_s5 = scalar_lea.hbm %s337_s28, 128  ;;  %s226_s0 = scalar_lea.hbm %s378_s1, 256 }
  0x1f   : > { %p223_p3 = scmp.ne.s32.totalorder %s337_s28, %s222_s5  ;;  %p227_p8 = scmp.lt.u32.totalorder %s337_s28, %s378_s1 }
  0x20   : > { %p228_p9 = scmp.lt.u32.totalorder %s226_s0, %s222_s5  ;;  %p230_p11 = scmp.lt.u32.totalorder %s222_s5, %s337_s28 }
  0x21   : > { %p224_p4 = pnand %p223_p3, %p321_p5 }
  0x22   : > { %p229_p10 = por %p228_p9, %p227_p8 }
  0x23   : > { %p225_p7 = pneg %p224_p4 }
  0x24   : > { %p231_p12 = por %p230_p11, %p229_p10 }
  0x26   : > { %p232_p13 = pnand %p231_p12, %p225_p7 }
  0x28   : > { %235 = shalt.err (!%p232_p13)
}
  0x29   : > { %169 = dma.vmem_to_hbm [thread:$0]  (%p321_p5), %s332_s23, 128, %s337_s28, %s101_s29  }
  0x2a PF: > { %p175_p0 = scmp.ge.s32.totalorder %s270_s11, 2  ;;  %s126_s15 = sand.u32 1, %s258_s8  }
  0x2b   : > { %s127_s19 = scalar_lea.sflag [#allocation4], %s126_s15 }
  0x2c   : > { %p172_p1 = pnand %p175_p0, %p325_p6 }
  0x2e   : > { %253 = dma.done.wait (!%p172_p1), %s127_s19, 128  }
  0x2f   : > { %255 = vsyncadd (!%p172_p1), %s127_s19, 4294967168  ;;  %p12_p2 = scmp.ge.s32.totalorder %s309_s13, 4   ;;  %s381_s8 = smov %s262_s9 }
  0x30   : > { %s382_s9 = smov %s266_s10  ;;  %s383_s10 = smov %s319_s16 }
  0x31   : > { %s384_s11 = smov %s309_s13  ;;  %14 = sbr.rel (!%p12_p2) target bundleno = 5 (0x5), region = 56 }
  0x38   :  { %132 = vsyncpa [#allocation4], 1 }
  0x39   :  { %134 = vsyncpa [#allocation4 + $0x1], 1 }

</bundles_post_ra>
